<compile_context>
chip_gen: v5e
topology: v5e:2x2
jax: 0.10.0
libtpu: 0.0.40
codegen_flags: <defaults>
</compile_context>

<pallas_src>
import functools

import jax
import jax.numpy as jnp
from jax.experimental import pallas as pl
from jax.experimental.pallas import tpu as pltpu

_LANE = 128
_VMEM_LIMIT_BYTES = 32 * 1024 * 1024   # explicit budget; safe on v5e/v6e/v7x
_TARGET_TILE_BYTES = 2 * 1024 * 1024   # per-buffer tile cap (f32)


def _pool_mlp_kernel(x_ref, w1_ref, w2_ref, attn_ref, sum_ref, max_ref,
                     *, hw, hw_tile):
    """Accumulate per-channel sum/max over spatial tiles; on the last tile run
    the fused (avg|max) -> fc1 -> relu -> fc2 -> sigmoid MLP."""
    t = pl.program_id(1)

    @pl.when(t == 0)
    def _init():
        sum_ref[...] = jnp.zeros_like(sum_ref)
        max_ref[...] = jnp.full_like(max_ref, -jnp.inf)

    x = x_ref[...]                                            # (C, T) f32
    # Mask lanes beyond the true spatial extent (last tile may be padded).
    lane = jax.lax.broadcasted_iota(jnp.int32, x.shape, 1)
    valid = (t * hw_tile + lane) < hw
    sum_ref[...] += jnp.sum(jnp.where(valid, x, 0.0), axis=1, keepdims=True)
    max_ref[...] = jnp.maximum(
        max_ref[...],
        jnp.max(jnp.where(valid, x, -jnp.inf), axis=1, keepdims=True))

    @pl.when(t == pl.num_programs(1) - 1)
    def _finalize():
        c = sum_ref.shape[0]
        avg = sum_ref[...] * (1.0 / hw)                       # (C, 1)
        mx = max_ref[...]                                     # (C, 1)
        # Fused MLP: stack [avg | max] into one (C, 2) block -> single pass
        # through fc1/fc2 instead of two (halves MXU pushes / weight loads).
        col = jax.lax.broadcasted_iota(jnp.int32, (c, 2), 1)
        p = jnp.where(col == 0, avg, mx)                      # (C, 2)
        h = jnp.dot(w1_ref[...], p, preferred_element_type=jnp.float32)
        h = jnp.maximum(h, 0.0)                               # (Cr, 2)
        a = jnp.dot(w2_ref[...], h, preferred_element_type=jnp.float32)  # (C, 2)
        # a[:, 0] + a[:, 1] == avg-branch + max-branch.
        attn_ref[...] = jax.nn.sigmoid(jnp.sum(a, axis=1, keepdims=True))


def _scale_kernel(attn_ref, x_ref, out_ref):
    # (C, T) * (C, 1) broadcast over the lane (spatial) axis.
    out_ref[...] = x_ref[...] * attn_ref[...]


def channel_attention(x_nchw, w1, w2, *, hw_tile=None):
    """x_nchw: (B, C, H, W) f32; w1: (Cr, C) fc1 weight; w2: (C, Cr) fc2 weight.

    Returns (x * attention) of shape (B, C, H, W) and attention (B, C, 1, 1),
    matching the PyTorch ChannelAttention forward."""
    B, C, H, W = x_nchw.shape
    Cr = w1.shape[0]
    HW = H * W
    x_flat = x_nchw.reshape(B, C, HW)

    hw_pad = pl.cdiv(HW, _LANE) * _LANE
    if hw_tile is None:
        hw_tile = max(_LANE, (_TARGET_TILE_BYTES // (C * 4)) // _LANE * _LANE)
    else:
        hw_tile = max(_LANE, (hw_tile // _LANE) * _LANE)
    hw_tile = min(hw_tile, hw_pad)
    n_t = pl.cdiv(HW, hw_tile)

    # ---- Pass 1: pooled sum/max + fused MLP -> per-channel attention ----
    attn = pl.pallas_call(
        functools.partial(_pool_mlp_kernel, hw=HW, hw_tile=hw_tile),
        out_shape=jax.ShapeDtypeStruct((B, C, 1), jnp.float32),
        grid_spec=pltpu.PrefetchScalarGridSpec(
            num_scalar_prefetch=0,
            grid=(B, n_t),
            in_specs=[
                pl.BlockSpec((None, C, hw_tile), lambda b, t: (b, 0, t)),
                pl.BlockSpec((Cr, C), lambda b, t: (0, 0)),
                pl.BlockSpec((C, Cr), lambda b, t: (0, 0)),
            ],
            out_specs=pl.BlockSpec((None, C, 1), lambda b, t: (b, 0, 0)),
            scratch_shapes=[
                pltpu.VMEM((C, 1), jnp.float32),   # running sum
                pltpu.VMEM((C, 1), jnp.float32),   # running max
            ],
        ),
        compiler_params=pltpu.CompilerParams(
            dimension_semantics=("parallel", "arbitrary"),
            vmem_limit_bytes=_VMEM_LIMIT_BYTES),
    )(x_flat, w1, w2)

    # ---- Pass 2: out = x * attention, streamed over spatial tiles ----
    out_flat = pl.pallas_call(
        _scale_kernel,
        out_shape=jax.ShapeDtypeStruct((B, C, HW), jnp.float32),
        grid_spec=pltpu.PrefetchScalarGridSpec(
            num_scalar_prefetch=0,
            grid=(B, n_t),
            in_specs=[
                pl.BlockSpec((None, C, 1), lambda b, t: (b, 0, 0)),
                pl.BlockSpec((None, C, hw_tile), lambda b, t: (b, 0, t)),
            ],
            out_specs=pl.BlockSpec((None, C, hw_tile), lambda b, t: (b, 0, t)),
        ),
        compiler_params=pltpu.CompilerParams(
            dimension_semantics=("parallel", "parallel"),
            vmem_limit_bytes=_VMEM_LIMIT_BYTES),
    )(attn, x_flat)

    return out_flat.reshape(B, C, H, W), attn.reshape(B, C, 1, 1)


def _kaiming_normal_fan_out(key, shape):
    # Conv2d weight (out_ch, in_ch, 1, 1), mode='fan_out', relu gain:
    # std = sqrt(2 / fan_out), fan_out = out_ch * kh * kw = out_ch.
    out_ch = shape[0]
    std = (2.0 / out_ch) ** 0.5
    return std * jax.random.normal(key, shape, dtype=jnp.float32)


def _reference(x, w1, w2):
    avg = jnp.mean(x, axis=(2, 3), keepdims=True)
    mx = jnp.max(x, axis=(2, 3), keepdims=True)

    def mlp(p):  # p: (B, C, 1, 1)
        h = jnp.einsum('rc,bcij->brij', w1, p)
        h = jnp.maximum(h, 0.0)
        return jnp.einsum('cr,brij->bcij', w2, h)

    attn = jax.nn.sigmoid(mlp(avg) + mlp(mx))
    return x * attn, attn


if __name__ == "__main__":
    key = jax.random.PRNGKey(0)
    k1, k2, kx1, kx2 = jax.random.split(key, 4)

    B, C = 2, 4
    reduction_ratio = 16
    Cr = max(C // reduction_ratio, 1)
    # fc1: Conv2d(C, Cr, 1, bias=False) -> (Cr, C); fc2: Conv2d(Cr, C, 1) -> (C, Cr)
    w1 = _kaiming_normal_fan_out(k1, (Cr, C))
    w2 = _kaiming_normal_fan_out(k2, (C, Cr))

    # Case 1: lane-aligned spatial size with a forced small tile so the
    # multi-tile sum/max accumulation path is exercised.
    x1 = jax.random.normal(kx1, (B, C, 16, 16), dtype=jnp.float32)
    out1, attn1 = channel_attention(x1, w1, w2, hw_tile=128)

    # Case 2: non-lane-aligned spatial size (exercises the padding mask).
    x2 = jax.random.normal(kx2, (B, C, 10, 10), dtype=jnp.float32)
    out2, attn2 = channel_attention(x2, w1, w2)

    jax.block_until_ready((out1, attn1, out2, attn2))

    for x, out, attn in ((x1, out1, attn1), (x2, out2, attn2)):
        out_ref, attn_ref = _reference(x, w1, w2)
        assert jnp.allclose(attn, attn_ref, atol=1e-5, rtol=1e-5)
        assert jnp.allclose(out, out_ref, atol=1e-5, rtol=1e-5)

    print("KERNEL_OK")
</pallas_src>

<mosaic_0001>
module attributes {stable_mosaic.version = 11 : i64} {
  func.func @_pool_mlp_kernel(%arg0: i32, %arg1: i32, %arg2: memref<1x4x128xf32, #tpu.memory_space<vmem>>, %arg3: memref<1x4xf32, #tpu.memory_space<vmem>>, %arg4: memref<4x1xf32, #tpu.memory_space<vmem>>, %arg5: memref<1x4x1xf32, #tpu.memory_space<vmem>>, %arg6: memref<4x1xf32, #tpu.memory_space<vmem>>, %arg7: memref<4x1xf32, #tpu.memory_space<vmem>>) attributes {dimension_semantics = [#tpu.dimension_semantics<parallel>, #tpu.dimension_semantics<arbitrary>], iteration_bounds = array<i64: 2, 2>, scalar_prefetch = 0 : i64, scratch_operands = 2 : i64, tpu.core_type = #tpu.core_type<tc>, window_params = [{transform_indices = @transform_0, window_bounds = array<i64: 1, 4, 128>}, {pipeline_mode = #tpu.pipeline_mode<synchronous>, transform_indices = @transform_1, window_bounds = array<i64: 1, 4>}, {pipeline_mode = #tpu.pipeline_mode<synchronous>, transform_indices = @transform_2, window_bounds = array<i64: 4, 1>}, {transform_indices = @transform_3, window_bounds = array<i64: 1, 4, 1>}]} {
    %c0_i32 = arith.constant 0 : i32
    %0 = arith.cmpi eq, %arg1, %c0_i32 : i32
    %1 = arith.extui %0 : i1 to i32
    %c0_i32_0 = arith.constant 0 : i32
    %2 = arith.cmpi ne, %1, %c0_i32_0 : i32
    scf.if %2 {
      %cst_15 = arith.constant 0.000000e+00 : f32
      %28 = vector.broadcast %cst_15 : f32 to vector<4x1xf32>
      %c0_16 = arith.constant 0 : index
      %c0_17 = arith.constant 0 : index
      %29 = vector.load %arg6[%c0_16, %c0_17] : memref<4x1xf32, #tpu.memory_space<vmem>>, vector<4x1xf32>
      tpu.vector_store %arg6[%c0_16, %c0_17], %28 {strides = array<i32>} : memref<4x1xf32, #tpu.memory_space<vmem>>, vector<4x1xf32>,
      %cst_18 = arith.constant 0xFF800000 : f32
      %30 = vector.broadcast %cst_18 : f32 to vector<4x1xf32>
      %c0_19 = arith.constant 0 : index
      %c0_20 = arith.constant 0 : index
      %31 = vector.load %arg7[%c0_19, %c0_20] : memref<4x1xf32, #tpu.memory_space<vmem>>, vector<4x1xf32>
      tpu.vector_store %arg7[%c0_19, %c0_20], %30 {strides = array<i32>} : memref<4x1xf32, #tpu.memory_space<vmem>>, vector<4x1xf32>,
    } else {
    }
    %c0 = arith.constant 0 : index
    %c0_1 = arith.constant 0 : index
    %c0_2 = arith.constant 0 : index
    %3 = vector.load %arg2[%c0, %c0_1, %c0_2] : memref<1x4x128xf32, #tpu.memory_space<vmem>>, vector<1x4x128xf32>
    %4 = vector.shape_cast %3 : vector<1x4x128xf32> to vector<4x128xf32>
    %5 = tpu.iota {dimensions = array<i32: 1>} : vector<4x128xi32>
    %c128_i32 = arith.constant 128 : i32
    %6 = arith.muli %arg1, %c128_i32 : i32
    %7 = vector.broadcast %6 : i32 to vector<4x128xi32>
    %8 = arith.addi %7, %5 : vector<4x128xi32>
    %c256_i32 = arith.constant 256 : i32
    %9 = vector.broadcast %c256_i32 : i32 to vector<4x128xi32>
    %10 = arith.cmpi slt, %8, %9 : vector<4x128xi32>
    %c0_3 = arith.constant 0 : index
    %c0_4 = arith.constant 0 : index
    %11 = vector.load %arg6[%c0_3, %c0_4] : memref<4x1xf32, #tpu.memory_space<vmem>>, vector<4x1xf32>
    %cst = arith.constant 0.000000e+00 : f32
    %12 = vector.broadcast %cst : f32 to vector<4x128xf32>
    %13 = arith.select %10, %4, %12 : vector<4x128xi1>, vector<4x128xf32>
    %cst_5 = arith.constant dense<0.000000e+00> : vector<4xf32>
    %14 = vector.multi_reduction <add>, %13, %cst_5 [1] : vector<4x128xf32> to vector<4xf32>
    %15 = vector.shape_cast %14 : vector<4xf32> to vector<4x1xf32>
    %16 = arith.addf %11, %15 : vector<4x1xf32>
    %c0_6 = arith.constant 0 : index
    %c0_7 = arith.constant 0 : index
    %17 = vector.load %arg6[%c0_6, %c0_7] : memref<4x1xf32, #tpu.memory_space<vmem>>, vector<4x1xf32>
    tpu.vector_store %arg6[%c0_6, %c0_7], %16 {strides = array<i32>} : memref<4x1xf32, #tpu.memory_space<vmem>>, vector<4x1xf32>,
    %c0_8 = arith.constant 0 : index
    %c0_9 = arith.constant 0 : index
    %18 = vector.load %arg7[%c0_8, %c0_9] : memref<4x1xf32, #tpu.memory_space<vmem>>, vector<4x1xf32>
    %cst_10 = arith.constant 0xFF800000 : f32
    %19 = vector.broadcast %cst_10 : f32 to vector<4x128xf32>
    %20 = arith.select %10, %4, %19 : vector<4x128xi1>, vector<4x128xf32>
    %cst_11 = arith.constant dense<0xFF800000> : vector<4xf32>
    %21 = vector.multi_reduction <maximumf>, %20, %cst_11 [1] : vector<4x128xf32> to vector<4xf32>
    %22 = vector.shape_cast %21 : vector<4xf32> to vector<4x1xf32>
    %23 = arith.maximumf %18, %22 : vector<4x1xf32>
    %c0_12 = arith.constant 0 : index
    %c0_13 = arith.constant 0 : index
    %24 = vector.load %arg7[%c0_12, %c0_13] : memref<4x1xf32, #tpu.memory_space<vmem>>, vector<4x1xf32>
    tpu.vector_store %arg7[%c0_12, %c0_13], %23 {strides = array<i32>} : memref<4x1xf32, #tpu.memory_space<vmem>>, vector<4x1xf32>,
    %c1_i32 = arith.constant 1 : i32
    %25 = arith.cmpi eq, %arg1, %c1_i32 : i32
    %26 = arith.extui %25 : i1 to i32
    %c0_i32_14 = arith.constant 0 : i32
    %27 = arith.cmpi ne, %26, %c0_i32_14 : i32
    scf.if %27 {
      %c0_15 = arith.constant 0 : index
      %c0_16 = arith.constant 0 : index
      %28 = vector.load %arg6[%c0_15, %c0_16] : memref<4x1xf32, #tpu.memory_space<vmem>>, vector<4x1xf32>
      %cst_17 = arith.constant 3.906250e-03 : f32
      %29 = vector.broadcast %cst_17 : f32 to vector<4x1xf32>
      %30 = arith.mulf %28, %29 : vector<4x1xf32>
      %c0_18 = arith.constant 0 : index
      %c0_19 = arith.constant 0 : index
      %31 = vector.load %arg7[%c0_18, %c0_19] : memref<4x1xf32, #tpu.memory_space<vmem>>, vector<4x1xf32>
      %32 = tpu.iota {dimensions = array<i32: 1>} : vector<4x2xi32>
      %c0_i32_20 = arith.constant 0 : i32
      %33 = vector.broadcast %c0_i32_20 : i32 to vector<4x2xi32>
      %34 = arith.cmpi eq, %32, %33 : vector<4x2xi32>
      %35 = vector.shape_cast %30 : vector<4x1xf32> to vector<4x1xf32>
      %36 = vector.broadcast %35 : vector<4x1xf32> to vector<4x2xf32>
      %37 = vector.shape_cast %31 : vector<4x1xf32> to vector<4x1xf32>
      %38 = vector.broadcast %37 : vector<4x1xf32> to vector<4x2xf32>
      %39 = arith.select %34, %36, %38 : vector<4x2xi1>, vector<4x2xf32>
      %c0_21 = arith.constant 0 : index
      %c0_22 = arith.constant 0 : index
      %40 = vector.load %arg3[%c0_21, %c0_22] : memref<1x4xf32, #tpu.memory_space<vmem>>, vector<1x4xf32>
      %cst_23 = arith.constant dense<0.000000e+00> : vector<1x2xf32>
      %41 = tpu.matmul %40, %39, %cst_23 {dimension_numbers = #tpu.dot_dimension_numbers<[1], [0], [0], [1], [0, 0, 1, 1], [], []>} : vector<1x4xf32>, vector<4x2xf32>, vector<1x2xf32> -> vector<1x2xf32>
      %cst_24 = arith.constant 0.000000e+00 : f32
      %42 = vector.broadcast %cst_24 : f32 to vector<1x2xf32>
      %43 = arith.maximumf %41, %42 : vector<1x2xf32>
      %c0_25 = arith.constant 0 : index
      %c0_26 = arith.constant 0 : index
      %44 = vector.load %arg4[%c0_25, %c0_26] : memref<4x1xf32, #tpu.memory_space<vmem>>, vector<4x1xf32>
      %cst_27 = arith.constant dense<0.000000e+00> : vector<4x2xf32>
      %45 = tpu.matmul %44, %43, %cst_27 {dimension_numbers = #tpu.dot_dimension_numbers<[1], [0], [0], [1], [0, 0, 1, 1], [], []>} : vector<4x1xf32>, vector<1x2xf32>, vector<4x2xf32> -> vector<4x2xf32>
      %cst_28 = arith.constant dense<0.000000e+00> : vector<4xf32>
      %46 = vector.multi_reduction <add>, %45, %cst_28 [1] : vector<4x2xf32> to vector<4xf32>
      %47 = vector.shape_cast %46 : vector<4xf32> to vector<4x1xf32>
      %48 = arith.negf %47 : vector<4x1xf32>
      %49 = math.exp %48 : vector<4x1xf32>
      %cst_29 = arith.constant 1.000000e+00 : f32
      %50 = vector.broadcast %cst_29 : f32 to vector<4x1xf32>
      %51 = arith.addf %50, %49 : vector<4x1xf32>
      %52 = arith.divf %50, %51 : vector<4x1xf32>
      %c0_30 = arith.constant 0 : index
      %c0_31 = arith.constant 0 : index
      %c0_32 = arith.constant 0 : index
      %53 = vector.load %arg5[%c0_30, %c0_31, %c0_32] : memref<1x4x1xf32, #tpu.memory_space<vmem>>, vector<1x4x1xf32>
      %54 = vector.shape_cast %53 : vector<1x4x1xf32> to vector<4x1xf32>
      %55 = vector.shape_cast %52 : vector<4x1xf32> to vector<1x4x1xf32>
      tpu.vector_store %arg5[%c0_30, %c0_31, %c0_32], %55 {strides = array<i32>} : memref<1x4x1xf32, #tpu.memory_space<vmem>>, vector<1x4x1xf32>,
    } else {
    }
    return
  }
  func.func @transform_0(%arg0: i32, %arg1: i32) -> (i32, i32, i32) {
    %c0_i32 = arith.constant 0 : i32
    %c0_i32_0 = arith.constant 0 : i32
    return %arg0, %c0_i32, %arg1 : i32, i32, i32
  }
  func.func @transform_1(%arg0: i32, %arg1: i32) -> (i32, i32) {
    %c0_i32 = arith.constant 0 : i32
    %c0_i32_0 = arith.constant 0 : i32
    %c0_i32_1 = arith.constant 0 : i32
    return %c0_i32, %c0_i32_0 : i32, i32
  }
  func.func @transform_2(%arg0: i32, %arg1: i32) -> (i32, i32) {
    %c0_i32 = arith.constant 0 : i32
    %c0_i32_0 = arith.constant 0 : i32
    %c0_i32_1 = arith.constant 0 : i32
    return %c0_i32, %c0_i32_0 : i32, i32
  }
  func.func @transform_3(%arg0: i32, %arg1: i32) -> (i32, i32, i32) {
    %c0_i32 = arith.constant 0 : i32
    %c0_i32_0 = arith.constant 0 : i32
    %c0_i32_1 = arith.constant 0 : i32
    return %arg0, %c0_i32, %c0_i32_0 : i32, i32, i32
  }
}

</mosaic_0001>

<bundles_post_ra>
// kernel: tpu_custom_call.1
= control target key start
LH: loop header
LB: loop body
LE: loop exit
PB: predicated region body
PF: predicated region fallthrough
CT: control target
= control target key end

     0   :  { %8 = vsyncpa [#allocation5], 0  ;;  %s764_s0 = inlined_call_operand.hbm [shape: f32[2,4,256], index: 0, kind: input, shape index: {}]   ;;  %s765_s1 = inlined_call_operand.vmem [shape: f32[1,4], index: 1, kind: input, shape index: {}]   ;;  %s766_s2 = inlined_call_operand.vmem [shape: f32[4,1], index: 2, kind: input, shape index: {}]   ;;  %s767_s3 = inlined_call_operand.vmem [shape: f32[2,4,1], index: 3, kind: output, shape index: {}]  }
   0x1   :  { %10 = vsyncpa [#allocation5 + $0x1], 0  ;;  %s633_s12 = smov 0   ;;  %s635_s13 = smov 0  }
   0x2   :  { %s637_s14 = smov 0   ;;  %s639_s15 = smov 0  }
   0x3   :  { %s641_s16 = smov 0   ;;  %s643_s17 = smov 0  }
   0x4   :  { %s645_s18 = smov 0   ;;  %s647_s19 = smov 0  }
   0x5 LB: > { %s413_s20 = sadd.s32 4294967295, %s608_s19   ;;  %s25_s21 = sadd.s32 1, %s600_s17  ;;  %s608_s19 = sphi %s647_s19, %s16_s19   ;;  %s604_s18 = sphi %s645_s18, %s776_s18   ;;  %s600_s17 = sphi %s643_s17, %s775_s17   ;;  %s596_s16 = sphi %s641_s16, %s774_s16   ;;  %s592_s15 = sphi %s639_s15, %s773_s15   ;;  %s588_s14 = sphi %s637_s14, %s772_s14   ;;  %s584_s13 = sphi %s635_s13, %s771_s13   ;;  %s580_s12 = sphi %s633_s12, %s770_s12  }
   0x6   : > { %p26_p0 = scmp.ge.s32.totalorder %s25_s21, 2  ;;  %s28_s22 = sadd.s32 1, %s604_s18 }
   0x7   : > { %s37_s23 = sadd.s32 1, %s588_s14  ;;  %p44_p1 = scmp.ne.s32.totalorder %s588_s14, %s584_s13 }
   0x8   : > { %s778_s21 = smov (%p26_p0, %s25_s21), 0  ;;  %s780_s22 = smov (!%p26_p0, %s28_s22), %s604_s18 }
   0x9   : > { %s33_s24 = ssub.s32 %s600_s17, %s778_s21  ;;  %p45_p2 = scmp.eq.s32.totalorder %s608_s19, 0 }
   0xa   : > { %p30_p3 = scmp.ge.s32.totalorder %s780_s22, 2  ;;  %p50_p4 = scmp.ne.s32.totalorder %s584_s13, %s580_s12 }
   0xb   : > { %p684_p5 = por %p45_p2, %p44_p1  ;;  %p51_p6 = scmp.eq.s32.totalorder %s413_s20, 0 }
   0xc   : > { %s782_s22 = smov (%p30_p3, %s780_s22), 0  ;;  %p439_p8 = scmp.lt.s32.totalorder %s608_s19, 4 }
   0xd   : > { %p690_p7 = por %p51_p6, %p50_p4  ;;  %s32_s27 = ssub.s32 %s604_s18, %s782_s22 }
   0xe   : > { %s34_s28 = sor.u32 %s33_s24, %s32_s27  ;;  %s148_s29 = sand.u32 1, %s588_s14  }
   0xf   : > { %p35_p9 = scmp.eq.s32.totalorder %s34_s28, 0  ;;  %s417_s30 = sshll.u32 %s148_s29, 2 }
  0x10   : > { %s418_s4 = sshll.u32 %s604_s18, 1  ;;  %s152_s8 = scalar_lea.vmem [#allocation4], %s417_s30 }
  0x11   : > { %s700_s5 = scalar_select %p35_p9, %s588_s14, %s37_s23  }
  0x12   : > { %s156_s6 = sadd.s32 %s600_s17, %s418_s4  ;;  %s162_s9 = sshll.u32 %s152_s8, 4  ;;  %s163_s9 = int_to_ptr.vmem [resolvable:$true] %s162_s9 }
  0x13   : > { %s419_s7 = sshll.u32 %s156_s6, 2  ;;  %p436_p10 = pnand %p439_p8, %p684_p5 }
  0x14   : > { %s158_s12 = scalar_lea.hbm %s764_s0, %s419_s7  ;;  %p420_p11 = scmp.ge.s32.totalorder %s608_s19, 1 }
  0x15   : > { %s160_s20 = sshll.u32 %s158_s12, 4  ;;  %p167_p12 = scmp.lt.s32.totalorder %s608_s19, 5  ;;  %s161_s20 = int_to_ptr.hbm [resolvable:$true] %s160_s20 }
  0x16   : > { %s149_s24 = scalar_lea.sflag [#allocation5], %s148_s29 }
  0x17   : > { %438 = dma.hbm_to_vmem [thread:$0]  (!%p436_p10), %s161_s20, 64, %s163_s9, %s149_s24  }
  0x18   : > { %p168_p13 = pnand %p420_p11, %p167_p12 }
  0x19   : > { %s173_s23 = sand.u32 (!%p168_p13), 1, %s584_s13  }
  0x1a   : > { %171 = sbr.rel (%p168_p13) target bundleno = 707 (0x2c3), region = 32  ;;  %s421_s27 = sshll.u32 (!%p168_p13), %s173_s23, 2 }
  0x1b   : > { %s174_s28 = scalar_lea.sflag (!%p168_p13), [#allocation5], %s173_s23  ;;  %s177_s30 = scalar_lea.vmem (!%p168_p13), [#allocation4], %s421_s27 }
  0x1f   : > { %575 = dma.done.wait (%p690_p7), %s174_s28, 64  }
  0x20   : > { %577 = vsyncadd (%p690_p7), %s174_s28, 4294967232  ;;  %p200_p0 = scmp.lt.s32.totalorder %s596_s16, 1  ;;  %p423_p1 = scmp.ne.s32.totalorder %s592_s15, 0 }
  0x22   : > { %s784_s16 = smov (!%p200_p0, %s596_s16), 1  ;;  %207 = sbr.rel (%p423_p1) target bundleno = 42 (0x2a), region = 40 }
  0x23   : > { %s422_s25 = sshll.u32 %s784_s16, 2 }
  0x24   : > { %s722_s6 = scalar_lea.vmem %s767_s3, %s422_s25 }
  0x27   : > { %vm208_vm0 = vcmask 3072   ;;  %v610_v0 = vmov 0.0   ;;  %v611_v1 = vmov -inf  }
  0x28   : > { %209 = vst.msk [vmem:[#allocation2] sm:$0xf] %vm208_vm0, %v610_v0 }
  0x29   : > { %210 = vst.msk [vmem:[#allocation3] sm:$0xf] %vm208_vm0, %v611_v1 }
  0x2a PF: > { %v212_v2 = vlaneseq  ;;  %s424_s26 = sshll.u32 %s592_s15, 7  ;;  %v211_v5 = vld [vmem:[%s177_s30] sm:$0xf]  ;;  %vm220_vm1 = vcmask 1043456   ;;  %vm225_vm3 = vcmask 3072   ;;  %p425_p2 = scmp.ne.s32.totalorder %s592_s15, 1 }
  0x2b   : > { %v215_v3 = vstv %s424_s26 }
  0x2c   : > { %v213_v4 = vand.u32 127, %v212_v2 }
  0x2e   : > { %v216_v6 = vadd.s32 %v215_v3, %v213_v4 }
  0x2f   : > { %v218_v11 = vld [vmem:[#allocation2] sm:$0xf] }
  0x30   : > { %vm217_vm2 = vcmp.lt.s32.totalorder %v216_v6, 256  ;;  %v227_v14 = vld [vmem:[#allocation3] sm:$0xf] }
  0x31   : > { %v219_v7 = vsel %vm217_vm2, %v211_v5, 0.0  ;;  %v228_v9 = vsel %vm217_vm2, %v211_v5, -inf }
  0x32   : > { %v221_v8 = vsel %vm220_vm1, %v219_v7, 0.0  ;;  %v229_v10 = vsel %vm220_vm1, %v228_v9, -inf }
  0x33   : > { %222 = vadd.xlane.f32.xlu0 %v221_v8 }
  0x3b   : > { %230 = vmax.xlane.f32.xlu0 %v229_v10 }
  0xa6   : > { %v223_v12 = vpop.xlane.xlu0 %222 }
  0xa7   : > { %v224_v13 = vadd.f32 %v223_v12, %v218_v11 }
  0xa9   : > { %226 = vst.msk [vmem:[#allocation2] sm:$0xf] %vm225_vm3, %v224_v13 }
  0xad   : > { %237 = sbr.rel (%p425_p2) target bundleno = 707 (0x2c3), region = 44 }
  0xae   : > { %v231_v15 = vpop.xlane.xlu0 %230 }
  0xaf   : > { %v232_v16 = vmax.f32 %v227_v14, %v231_v15 }
  0xb1   : > { %233 = vst.msk [vmem:[#allocation3] sm:$0xf] %vm225_vm3, %v232_v16 }
  0xb2   : > { %v238_v17 = vld [vmem:[#allocation2] sm:$0xf]  ;;  %v612_v18 = vmov 0   ;;  %vm241_vm4 = vcmp.eq.s32.totalorder %v213_v4, 0  ;;  %vm254_vm5 = vcmask 31744   ;;  %vm287_vm6 = vcmask 1040384  }
  0xb3   : > { %507 = vset.pattern.permute.xlu0 %v612_v18  ;;  %v239_v19 = vmul.f32 0.00390625, %v238_v17  ;;  %v253_v23 = vld [vmem:[%s765_s1] sm:$0x1]  ;;  %vm283_vm7 = vcmask 7168   ;;  %vm311_vm8 = vcmask 11264  }
  0xb4   : > { %v282_v27 = vld [vmem:[%s766_s2] sm:$0xf] }
  0xb5   : > { %244 = vperm.xlu0 %507, %v239_v19  }
  0xb8   : > { %v240_v20 = vld [vmem:[#allocation3] sm:$0xf] }
  0xbd   : > { %249 = vperm.xlu0 %507, %v240_v20  }
 0x127   : > { %v245_v21 = vpop.permute.xlu0 %244 }
 0x12f   : > { %v250_v22 = vpop.permute.xlu0 %249 }
 0x130   : > { %v252_v24 = vsel %vm241_vm4, %v245_v21, %v250_v22 }
 0x131   : > { %426 = vmatpush.msk.msra.mxu0 %vm220_vm1, %v252_v24 }
 0x132   : > { %427 = vmatmul.msk.f32.vlgmr.msra.gmra.mxu0 %vm254_vm5, %v253_v23 }
 0x1af   : > { %v278_v25 = vpop.f32.mrf.mxu0 }
 0x1b0   : > { %v281_v26 = vmax.f32 %v278_v25, 0.0 }
 0x1b2   : > { %428 = vmatpush.msk.msra.mxu1 %vm287_vm6, %v281_v26 }
 0x1b3   : > { %429 = vmatmul.msk.f32.vlgmr.msra.gmra.mxu1 %vm283_vm7, %v282_v27 }
 0x230   : > { %v308_v28 = vpop.f32.mrf.mxu1 }
 0x231   : > { %v312_v29 = vsel %vm311_vm8, %v308_v28, 0.0 }
 0x232   : > { %313 = vadd.xlane.f32.xlu1 %v312_v29 }
 0x2a5   : > { %v314_v30 = vpop.xlane.xlu1 %313 }
 0x2a6   : > { %v430_v31 = vmul.f32 -1.442695, %v314_v30 }
 0x2a8   : > { %508 = vpow2.f32 %v430_v31 }
 0x2ae   : > { %v509_v32 = vpop.eup %508 }
 0x2af   : > { %v318_v33 = vadd.f32 1.0, %v509_v32 }
 0x2b1   : > { %510 = vrcp.f32 %v318_v33  ;;  %v330_v37 = vand.u32 2147483648, %v318_v33  ;;  %v328_v39 = vand.u32 2147483647, %v318_v33  ;;  %vm324_vm10 = vweird.f32 %v318_v33 }
 0x2b3   : > { %v331_v41 = vor.u32 1.1754944e-38, %v330_v37  ;;  %vm329_vm12 = vcmp.eq.f32.partialorder %v328_v39, 8.507059e+37 }
 0x2b7   : > { %v511_v34 = vpop.eup %510 }
 0x2b8   : > { %v320_v35 = vmul.f32 %v511_v34, %v318_v33  ;;  %vm325_vm9 = vweird.f32 %v511_v34 }
 0x2b9   : > { %vm326_vm11 = vmor %vm324_vm10, %vm325_vm9 }
 0x2ba   : > { %v321_v36 = vsub.f32 1.0, %v320_v35 }
 0x2bc   : > { %v322_v38 = vmul.f32 %v511_v34, %v321_v36 }
 0x2be   : > { %v323_v40 = vadd.f32 %v511_v34, %v322_v38 }
 0x2c0   : > { %v327_v42 = vsel %vm326_vm11, %v511_v34, %v323_v40 }
 0x2c1   : > { %v332_v43 = vsel %vm329_vm12, %v331_v41, %v327_v42 }
 0x2c2   : > { %334 = vst.msk [vmem:[%s722_s6] sm:$0xf] %vm225_vm3, %v332_v43 }
 0x2c3 PF: > { %s16_s19 = sadd.s32 1, %s608_s19   ;;  %s770_s12 = smov %s584_s13 }
 0x2c4   : > { %p13_p3 = scmp.ge.s32.totalorder %s16_s19, 6   ;;  %s771_s13 = smov %s588_s14 }
 0x2c5   : > { %s772_s14 = smov %s700_s5  ;;  %s773_s15 = smov %s600_s17 }
 0x2c6   : > { %s774_s16 = smov %s604_s18  ;;  %s775_s17 = smov %s778_s21 }
 0x2c7   : > { %s776_s18 = smov %s782_s22  ;;  %15 = sbr.rel (!%p13_p3) target bundleno = 5 (0x5), region = 80 }
 0x2cc   :  { %354 = vsyncpa [#allocation5], 1 }
 0x2cd   :  { %356 = vsyncpa [#allocation5 + $0x1], 1 }

</bundles_post_ra>
